<compile_context>
chip_gen: v7x
topology: tpu7x:2x2x1
jax: 0.10.0
libtpu: 0.0.40
codegen_flags: <defaults>
</compile_context>

<pallas_src>
import functools

import numpy as np
import jax
import jax.numpy as jnp
from jax.experimental import pallas as pl
from jax.experimental.pallas import tpu as pltpu


# ------------------------------ chip-aware VMEM ----------------------------- #

def _vmem_limit_bytes() -> int:
    """~60% of physical VMEM: ~76 MiB on v5e/v6e (128 MiB), ~38 MiB on v7x (64 MiB)."""
    try:
        cap = int(pltpu.get_tpu_info().vmem_capacity_bytes)
    except Exception:
        cap = 64 * 1024 * 1024
    return int(min(max(cap * 3 // 5, 32 * 1024 * 1024), 96 * 1024 * 1024))


# ----------------------------- Pallas kernels ------------------------------ #

def _proj_kernel(f_ref, wT_ref, b_ref, o_ref):
    # f: [1, Cf, tS] (S-tile of Hf*Wf), wT: [K, Cf], b: [K, 1]  ->  o: [1, K, tS]
    # Contraction over Cf straight from the NCHW layout; output lane axis is S
    # (lane-dense stores); f32 accumulate, stored in the pipeline dtype.
    proj = jnp.dot(wT_ref[...], f_ref[0], preferred_element_type=jnp.float32)
    o_ref[0] = (proj + b_ref[...]).astype(o_ref.dtype)


def _make_upsample_kernel(blk, hf, wf, h, w, mat_dtype):
    def kernel(x_ref, uwt_ref, uh_ref, o_ref):
        # x: [blk, Hf, Wf], uwt: [Wf, W], uh: [H, Hf]  ->  o: [blk, H, W]
        uwt = uwt_ref[...]     # resident across grid steps (constant index_map)
        uh = uh_ref[...]
        # Width-first, batched over the block: one (blk*Hf, Wf) @ (Wf, W) matmul.
        # Result and all stores are lane-dense in W (Wf is typically < 128).
        xb = x_ref[...].reshape(blk * hf, wf).astype(mat_dtype)
        wide = jnp.dot(xb, uwt, preferred_element_type=jnp.float32)  # (blk*Hf, W)
        wide = wide.reshape(blk, hf, w).astype(mat_dtype)
        for i in range(blk):   # per-image height matmul, writes straight to o_ref
            o_ref[i] = jnp.dot(uh, wide[i],
                               preferred_element_type=jnp.float32).astype(o_ref.dtype)
    return kernel


# ------------------------------ glue / wrapper ----------------------------- #

@functools.lru_cache(maxsize=None)
def _make_bilinear_matrix(out_size: int, in_size: int) -> np.ndarray:
    """Row-stochastic interpolation matrix matching F.interpolate(bilinear,
    align_corners=False) half-pixel-center semantics. Pure numpy, cached."""
    i = np.arange(out_size)
    src = (i + 0.5) * (in_size / out_size) - 0.5
    src = np.clip(src, 0.0, in_size - 1)
    lo = np.floor(src).astype(np.int64)
    hi = np.minimum(lo + 1, in_size - 1)
    frac = (src - lo).astype(np.float32)
    M = np.zeros((out_size, in_size), dtype=np.float32)
    M[i, lo] += 1.0 - frac
    M[i, hi] += frac
    return M


def _choose_s_tile(s, cf, k, in_isz, out_isz, vmem_limit):
    """Lane tile for the projection: double-buffered feature+output blocks plus
    the small f32 accumulator must fit the limit; multiple of 128 (or full S)."""
    per_col = 2 * cf * in_isz + 2 * k * out_isz + k * 4
    const = (k * cf + k) * 4 * 2
    avail = max(vmem_limit - const - (2 << 20), 128 * per_col)
    max_ts = max(128, (avail // per_col) // 128 * 128)
    return int(s if s <= max_ts else max_ts)


def _choose_image_block(nbk, hf, wf, h, w, in_isz, out_isz, mat_isz, vmem_limit):
    """Images per upsample grid step. Accounts for double-buffered input/output
    blocks, the in-kernel f32 'wide' intermediate, resident Uh/UwT (counted
    double-buffered) and headroom. Prefers an even step count (v7x: 2 TCs).
    Divisibility is NOT required (partial last block is fine)."""
    per_img = 2 * hf * wf * in_isz + 2 * h * w * out_isz + hf * w * 4
    const = (h * hf + wf * w) * mat_isz * 2 + h * w * 4 + (2 << 20)
    avail = max(vmem_limit - const, per_img)
    max_blk = int(max(1, min(avail // per_img, nbk, 64)))
    steps = -(-nbk // max_blk)
    if steps > 1 and steps % 2 == 1:
        steps += 1
    steps = min(steps, nbk)
    return int(-(-nbk // steps))


def upsampler_forward(features, orig_inputs, w, b):
    """features: [B, Cf, Hf, Wf], orig_inputs: [B, C, H, W]
       w: [Cf, K], b: [K]   ->   heatmaps [B, K, H, W] (features dtype)."""
    B, Cf, Hf, Wf = features.shape
    _, _, H, W = orig_inputs.shape
    K = w.shape[1]
    S = Hf * Wf
    out_dtype = features.dtype
    mat_dtype = jnp.bfloat16 if np.dtype(out_dtype) == np.dtype(jnp.bfloat16) else jnp.float32
    vmem_limit = _vmem_limit_bytes()

    in_isz = np.dtype(features.dtype).itemsize
    out_isz = np.dtype(out_dtype).itemsize
    mat_isz = np.dtype(mat_dtype).itemsize

    # Tiny parameter reshapes (Cf*K elements) — negligible.
    wT = jnp.asarray(w).T.astype(jnp.float32)            # (K, Cf)
    b2 = jnp.asarray(b).astype(jnp.float32).reshape(K, 1)

    # Free contiguous flatten of NCHW spatial dims (no transpose copy).
    feats = features.reshape(B, Cf, S)

    # --- 1x1 conv (channel projection): grid over (batch, S tiles) ----------
    tS = _choose_s_tile(S, Cf, K, in_isz, out_isz, vmem_limit)
    proj = pl.pallas_call(
        _proj_kernel,
        out_shape=jax.ShapeDtypeStruct((B, K, S), out_dtype),
        grid=(B, pl.cdiv(S, tS)),
        in_specs=[
            pl.BlockSpec((1, Cf, tS), lambda bi, si: (bi, 0, si)),
            pl.BlockSpec((K, Cf), lambda bi, si: (0, 0)),   # resident
            pl.BlockSpec((K, 1), lambda bi, si: (0, 0)),    # resident
        ],
        out_specs=pl.BlockSpec((1, K, tS), lambda bi, si: (bi, 0, si)),
        compiler_params=pltpu.CompilerParams(
            dimension_semantics=("parallel", "parallel"),
            vmem_limit_bytes=vmem_limit),
    )(feats, wT, b2)

    # Free contiguous reshape: [B, K, Hf*Wf] -> [B*K, Hf, Wf] (no transpose).
    NBK = B * K
    imgs = proj.reshape(NBK, Hf, Wf)

    # Interpolation matrices (host-side constants, cached).
    Uh = jnp.asarray(_make_bilinear_matrix(H, Hf)).astype(mat_dtype)      # (H, Hf)
    UwT = jnp.asarray(_make_bilinear_matrix(W, Wf).T).astype(mat_dtype)   # (Wf, W)

    # --- bilinear upsample: blk images per grid step, width-first matmuls ---
    blk = _choose_image_block(NBK, Hf, Wf, H, W, out_isz, out_isz, mat_isz, vmem_limit)
    heat = pl.pallas_call(
        _make_upsample_kernel(blk, Hf, Wf, H, W, mat_dtype),
        out_shape=jax.ShapeDtypeStruct((NBK, H, W), out_dtype),
        grid=(pl.cdiv(NBK, blk),),
        in_specs=[
            pl.BlockSpec((blk, Hf, Wf), lambda i: (i, 0, 0)),
            pl.BlockSpec((Wf, W), lambda i: (0, 0)),        # resident
            pl.BlockSpec((H, Hf), lambda i: (0, 0)),        # resident
        ],
        out_specs=pl.BlockSpec((blk, H, W), lambda i: (i, 0, 0)),
        compiler_params=pltpu.CompilerParams(
            dimension_semantics=("parallel",),
            vmem_limit_bytes=vmem_limit),
    )(imgs, UwT, Uh)

    return heat.reshape(B, K, H, W)


# --------------------------------- main ------------------------------------ #

if __name__ == "__main__":
    B, Cf, Hf, Wf = 2, 32, 8, 8      # features
    C, H, W = 3, 32, 32              # original inputs (4x upsample)
    K = 4                            # num_keypoints

    key = jax.random.PRNGKey(0)
    k1, k2, k3, k4 = jax.random.split(key, 4)
    features = jax.random.normal(k1, (B, Cf, Hf, Wf), dtype=jnp.float32)
    orig_inputs = jax.random.normal(k2, (B, C, H, W), dtype=jnp.float32)
    w = jax.random.normal(k3, (Cf, K), dtype=jnp.float32) * 0.1
    b = jax.random.normal(k4, (K,), dtype=jnp.float32) * 0.01

    out = upsampler_forward(features, orig_inputs, w, b)
    out = jax.block_until_ready(out)
    assert out.shape == (B, K, H, W), out.shape

    # Reference in numpy (float64 accumulate), same math: Uh @ P @ Uw^T.
    f_np = np.asarray(features, dtype=np.float64)
    w_np = np.asarray(w, dtype=np.float64)
    b_np = np.asarray(b, dtype=np.float64)
    proj_ref = np.einsum("bchw,ck->bkhw", f_np, w_np) + b_np[None, :, None, None]
    Uh_np = _make_bilinear_matrix(H, Hf).astype(np.float64)
    Uw_np = _make_bilinear_matrix(W, Wf).astype(np.float64)
    ref = np.einsum("Hh,bkhw,Ww->bkHW", Uh_np, proj_ref, Uw_np)
    np.testing.assert_allclose(np.asarray(out, dtype=np.float64), ref,
                               rtol=1e-2, atol=1e-2)

    print("KERNEL_OK")
</pallas_src>

<mosaic_0001>
module attributes {stable_mosaic.version = 11 : i64} {
  func.func @_proj_kernel(%arg0: i32, %arg1: i32, %arg2: memref<1x32x64xf32, #tpu.memory_space<vmem>>, %arg3: memref<4x32xf32, #tpu.memory_space<vmem>>, %arg4: memref<4x1xf32, #tpu.memory_space<vmem>>, %arg5: memref<1x4x64xf32, #tpu.memory_space<vmem>>) attributes {dimension_semantics = [#tpu.dimension_semantics<parallel>, #tpu.dimension_semantics<parallel>], iteration_bounds = array<i64: 2, 1>, scalar_prefetch = 0 : i64, scratch_operands = 0 : i64, tpu.core_type = #tpu.core_type<tc>, window_params = [{transform_indices = @transform_0, window_bounds = array<i64: 1, 32, 64>}, {pipeline_mode = #tpu.pipeline_mode<synchronous>, transform_indices = @transform_1, window_bounds = array<i64: 4, 32>}, {pipeline_mode = #tpu.pipeline_mode<synchronous>, transform_indices = @transform_2, window_bounds = array<i64: 4, 1>}, {transform_indices = @transform_3, window_bounds = array<i64: 1, 4, 64>}]} {
    %c0 = arith.constant 0 : index
    %c0_0 = arith.constant 0 : index
    %0 = vector.load %arg3[%c0, %c0_0] : memref<4x32xf32, #tpu.memory_space<vmem>>, vector<4x32xf32>
    %c0_1 = arith.constant 0 : index
    %c0_2 = arith.constant 0 : index
    %c0_3 = arith.constant 0 : index
    %1 = vector.load %arg2[%c0_1, %c0_2, %c0_3] : memref<1x32x64xf32, #tpu.memory_space<vmem>>, vector<1x32x64xf32>
    %2 = vector.shape_cast %1 : vector<1x32x64xf32> to vector<32x64xf32>
    %cst = arith.constant dense<0.000000e+00> : vector<4x64xf32>
    %3 = tpu.matmul %0, %2, %cst {dimension_numbers = #tpu.dot_dimension_numbers<[1], [0], [0], [1], [0, 0, 1, 1], [], []>} : vector<4x32xf32>, vector<32x64xf32>, vector<4x64xf32> -> vector<4x64xf32>
    %c0_4 = arith.constant 0 : index
    %c0_5 = arith.constant 0 : index
    %4 = vector.load %arg4[%c0_4, %c0_5] : memref<4x1xf32, #tpu.memory_space<vmem>>, vector<4x1xf32>
    %5 = vector.broadcast %4 : vector<4x1xf32> to vector<4x64xf32>
    %6 = arith.addf %3, %5 : vector<4x64xf32>
    %c0_6 = arith.constant 0 : index
    %c0_7 = arith.constant 0 : index
    %c0_8 = arith.constant 0 : index
    %7 = vector.load %arg5[%c0_6, %c0_7, %c0_8] : memref<1x4x64xf32, #tpu.memory_space<vmem>>, vector<1x4x64xf32>
    %8 = vector.shape_cast %7 : vector<1x4x64xf32> to vector<4x64xf32>
    %9 = vector.shape_cast %6 : vector<4x64xf32> to vector<1x4x64xf32>
    tpu.vector_store %arg5[%c0_6, %c0_7, %c0_8], %9 {strides = array<i32>} : memref<1x4x64xf32, #tpu.memory_space<vmem>>, vector<1x4x64xf32>,
    return
  }
  func.func @transform_0(%arg0: i32, %arg1: i32) -> (i32, i32, i32) {
    %c0_i32 = arith.constant 0 : i32
    %c0_i32_0 = arith.constant 0 : i32
    return %arg0, %c0_i32, %arg1 : i32, i32, i32
  }
  func.func @transform_1(%arg0: i32, %arg1: i32) -> (i32, i32) {
    %c0_i32 = arith.constant 0 : i32
    %c0_i32_0 = arith.constant 0 : i32
    %c0_i32_1 = arith.constant 0 : i32
    return %c0_i32, %c0_i32_0 : i32, i32
  }
  func.func @transform_2(%arg0: i32, %arg1: i32) -> (i32, i32) {
    %c0_i32 = arith.constant 0 : i32
    %c0_i32_0 = arith.constant 0 : i32
    %c0_i32_1 = arith.constant 0 : i32
    return %c0_i32, %c0_i32_0 : i32, i32
  }
  func.func @transform_3(%arg0: i32, %arg1: i32) -> (i32, i32, i32) {
    %c0_i32 = arith.constant 0 : i32
    %c0_i32_0 = arith.constant 0 : i32
    return %arg0, %c0_i32, %arg1 : i32, i32, i32
  }
}

</mosaic_0001>

<bundles_post_ra>
// kernel: tpu_custom_call.1
= control target key start
LH: loop header
LB: loop body
LE: loop exit
PB: predicated region body
PF: predicated region fallthrough
CT: control target
= control target key end

     0   :  { %8 = vsyncpa [#allocation3], 0  ;;  %s818_s0 = inlined_call_operand.hbm [shape: f32[2,32,64], index: 0, kind: input, shape index: {}]   ;;  %s819_s1 = inlined_call_operand.vmem [shape: f32[4,32], index: 1, kind: input, shape index: {}]   ;;  %s820_s2 = inlined_call_operand.vmem [shape: f32[4,1], index: 2, kind: input, shape index: {}]   ;;  %s821_s3 = inlined_call_operand.hbm [shape: f32[2,4,64], index: 3, kind: output, shape index: {}]  }
   0x1   :  { %10 = vsyncpa [#allocation3 + $0x1], 0 }
   0x2   :  { %11 = vsyncpa [#allocation4], 0 }
   0x3   :  { %13 = vsyncpa [#allocation4 + $0x1], 0  ;;  %s638_s12 = smov 0   ;;  %s640_s13 = smov 0  }
   0x4   :  { %s642_s14 = smov 0   ;;  %s644_s15 = smov 0  }
   0x5   :  { %s646_s16 = smov 0   ;;  %s648_s17 = smov 0  }
   0x6 LB: > { %s389_s18 = sadd.s32 4294967295, %s608_s17   ;;  %s390_s19 = sadd.s32 4294967294, %s608_s17   ;;  %s608_s17 = sphi %s648_s17, %s19_s17   ;;  %s604_s16 = sphi %s646_s16, %s836_s16   ;;  %s600_s15 = sphi %s644_s15, %s835_s15   ;;  %s596_s14 = sphi %s642_s14, %s834_s14   ;;  %s592_s13 = sphi %s640_s13, %s833_s13   ;;  %s588_s12 = sphi %s638_s12, %s832_s12  }
   0x7   : > { %s31_s20 = sadd.s32 1, %s604_s16  ;;  %s40_s21 = sadd.s32 1, %s596_s14 }
   0x8   : > { %p33_p0 = scmp.ge.s32.totalorder %s31_s20, 2  ;;  %p47_p1 = scmp.ne.s32.totalorder %s596_s14, %s592_s13 }
   0x9   : > { %p48_p2 = scmp.eq.s32.totalorder %s608_s17, 0  ;;  %p53_p3 = scmp.ne.s32.totalorder %s592_s13, %s588_s12 }
   0xa   : > { %s838_s20 = smov (%p33_p0, %s31_s20), 0  ;;  %p54_p5 = scmp.eq.s32.totalorder %s389_s18, 0 }
   0xb   : > { %p679_p4 = por %p48_p2, %p47_p1  ;;  %s35_s23 = ssub.s32 %s604_s16, %s838_s20 }
   0xc   : > { %p121_p6 = scmp.eq.s32.totalorder %s389_s18, 1  ;;  %p38_p7 = scmp.eq.s32.totalorder %s35_s23, 0 }
   0xd   : > { %p685_p8 = por %p54_p5, %p53_p3  ;;  %p127_p10 = scmp.eq.s32.totalorder %s390_s19, 1 }
   0xe   : > { %p689_p9 = por %p121_p6, %p47_p1  ;;  %p439_p13 = scmp.lt.s32.totalorder %s608_s17, 2 }
   0xf   : > { %s694_s26 = scalar_select %p38_p7, %s596_s14, %s40_s21  }
  0x10   : > { %s825_s25 = scalar_select %p689_p9, 1, 0 }
  0x11   : > { %p696_p11 = por %p127_p10, %p53_p3  ;;  %s153_s28 = sand.u32 1, %s596_s14  }
  0x12   : > { %s393_s29 = sshll.u32 %s153_s28, 5  ;;  %s404_s30 = sshll.u32 %s604_s16, 9 }
  0x13   : > { %s826_s27 = scalar_select %p696_p11, 1, 0 }
  0x14   : > { %s707_s6 = scalar_lea.hbm %s818_s0, %s404_s30  ;;  %s157_s7 = scalar_lea.vmem [#allocation2], %s393_s29 }
  0x15   : > { %s165_s8 = sshll.u32 %s157_s7, 4  ;;  %p713_p0 = pnand %p439_p13, %p679_p4  ;;  %s709_s8 = int_to_ptr.vmem [resolvable:$true] %s165_s8 }
  0x16   : > { %s718_s10 = scalar_lea.sflag [#allocation3], %s153_s28  ;;  %s496_s11 = scalar_lea.hbm %s707_s6, 512 }
  0x17   : > { %p497_p2 = scmp.ne.s32.totalorder %s707_s6, %s496_s11  ;;  %p498_p3 = pneg %p713_p0 }
  0x18   : > { %s501_s21 = scalar_lea.hbm %s818_s0, 1024  ;;  %p502_p4 = scmp.lt.u32.totalorder %s707_s6, %s818_s0 }
  0x19   : > { %p499_p5 = pnand %p498_p3, %p497_p2  ;;  %p503_p7 = scmp.lt.u32.totalorder %s501_s21, %s496_s11 }
  0x1a   : > { %p505_p13 = scmp.lt.u32.totalorder %s496_s11, %s707_s6 }
  0x1b   : > { %p500_p6 = pneg %p499_p5  ;;  %p504_p10 = por %p503_p7, %p502_p4 }
  0x1d   : > { %p506_p12 = por %p505_p13, %p504_p10 }
  0x1f   : > { %p507_p1 = pnand %p506_p12, %p500_p6 }
  0x21   : > { %510 = shalt.err (!%p507_p1)
}
  0x22   : > { %s511_s28 = scalar_lea.vmem %s709_s8, 512  ;;  %s610_s29 = smov [#allocation2]  }
  0x23   : > { %p512_p2 = scmp.ne.s32.totalorder %s709_s8, %s511_s28  ;;  %s516_s30 = sshll.u32 %s610_s29, 4  ;;  %s517_s30 = int_to_ptr.vmem [resolvable:$false] %s516_s30 }
  0x24   : > { %s518_s4 = scalar_lea.vmem %s517_s30, 1024  ;;  %p519_p9 = scmp.lt.s32.totalorder %s709_s8, %s517_s30 }
  0x25   : > { %p514_p5 = pnand %p512_p2, %p498_p3  ;;  %p520_p4 = scmp.lt.s32.totalorder %s518_s4, %s511_s28 }
  0x27   : > { %p515_p11 = pneg %p514_p5  ;;  %p521_p7 = por %p520_p4, %p519_p9 }
  0x29   : > { %p522_p10 = pnand %p521_p7, %p515_p11 }
  0x2b   : > { %525 = shalt.err (!%p522_p10)
}
  0x2c   : > { %s611_s5 = smov 128   ;;  %s612_s7 = smov 8  }
  0x2d   : > { %434 = dma.hbm_to_vmem [thread:$0]  (!%p713_p0), %s707_s6, 512, %s709_s8, %s718_s10, %s611_s5, %s611_s5, %s612_s7  }
  0x2e   : > { %p173_p12 = scmp.lt.s32.totalorder %s608_s17, 3  ;;  %p828_p1 = scmp.ge.s32.totalorder %s608_s17, 1 }
  0x30   : > { %p174_p3 = pnand %p828_p1, %p173_p12 }
  0x31   : > { %s750_s11 = sand.u32 (!%p174_p3), 1, %s592_s13  }
  0x32   : > { %177 = sbr.rel (%p174_p3) target bundleno = 297 (0x129), region = 32  ;;  %s397_s18 = sshll.u32 (!%p174_p3), %s750_s11, 5 }
  0x33   : > { %s180_s19 = scalar_lea.sflag (!%p174_p3), [#allocation3], %s750_s11  ;;  %s183_s21 = scalar_lea.vmem (!%p174_p3), [#allocation2], %s397_s18 }
  0x39   : > { %579 = dma.done.wait (%p685_p8), %s180_s19, 512  }
  0x3a   : > { %581 = vsyncadd (%p685_p8), %s180_s19, 4294966784  ;;  %v613_v0 = vmov 0.0|0.0   ;;  %vm614_vm0 = vmmov 0   ;;  %v615_v1 = vmov 0.0   ;;  %v616_v2 = vmov 0   ;;  %v207_v3 = vld [vmem:[%s183_s21] sm:$0xff] }
  0x3b   : > { %421 = vmatprep.subr.bf16.mxu0 %v613_v0  ;;  %418 = vmatprep.mubr.msk.f32.mxu0 %vm614_vm0, %v615_v1  ;;  %v208_v4 = vld [vmem:[%s183_s21 + $0x8] sm:$0xff]  ;;  %v209_v5 = vld [vmem:[%s183_s21 + $0x10] sm:$0xff]  ;;  %v210_v7 = vld [vmem:[%s183_s21 + $0x18] sm:$0xff]  ;;  %vm217_vm1 = vcmask 261120   ;;  %s398_s10 = sshll.u32 %s750_s11, 2  ;;  %s401_s22 = sshll.u32 %s600_s15, 6 }
  0x3c   : > { %495 = vset.pattern.permute.xlu0 %v616_v2  ;;  %v422_v6 = vpack.c.bf16 %v208_v4, %v207_v3  ;;  %v211_v8 = vld [vmem:[%s820_s2] sm:$0xf]  ;;  %v425_v9 = vpack.c.bf16 %v210_v7, %v209_v5  ;;  %s205_s23 = scalar_lea.vmem [#allocation5], %s398_s10  ;;  %vm291_vm2 = vcmask 519168   ;;  %s769_s4 = scalar_lea.hbm %s821_s3, %s401_s22 }
  0x3d   : > { %214 = vperm.xlu0 %495, %v211_v8   ;;  %v206_v10 = vld [vmem:[%s819_s1] sm:$0xf]  ;;  %s308_s28 = sshll.u32 %s205_s23, 4  ;;  %s294_s5 = scalar_lea.sflag [#allocation4], %s750_s11  ;;  %s771_s28 = int_to_ptr.vmem [resolvable:$true] %s308_s28 }
  0x3e   : > { %423 = vmatpush3.bf16.msra.mxu0 %v422_v6  ;;  %s526_s7 = scalar_lea.vmem %s771_s28, 64  ;;  %p829_p9 = scmp.ne.s32.totalorder %s825_s25, 0 }
  0x3f   : > { %424 = vmatprep.subr.bf16.mxu0 %v613_v0  ;;  %p527_p8 = scmp.ne.s32.totalorder %s771_s28, %s526_s7  ;;  %s617_s15 = smov [#allocation5]  }
  0x40   : > { %s530_s18 = sshll.u32 %s617_s15, 4  ;;  %s531_s18 = int_to_ptr.vmem [resolvable:$false] %s530_s18 }
  0x41   : > { %p528_p11 = pnand %p527_p8, %p829_p9  ;;  %s532_s19 = scalar_lea.vmem %s531_s18, 128 }
  0x42   : > { %426 = vmatpush3.bf16.msra.mxu0 %v425_v9  ;;  %p533_p6 = scmp.lt.s32.totalorder %s771_s28, %s531_s18  ;;  %p534_p13 = scmp.lt.s32.totalorder %s532_s19, %s526_s7 }
  0x43   : > { %p529_p0 = pneg %p528_p11 }
  0x44   : > { %p535_p2 = por %p534_p13, %p533_p6 }
  0x45   : > { %419 = vmatmul.mubr.msk.f32.vlgmr.msra.gmra.mrb[0].mxu0 %vm217_vm1, %v206_v10 }
  0x46   : > { %p536_p5 = pnand %p535_p2, %p529_p0 }
  0xbc   : > { %v215_v11 = vpop.permute.xlu0 %214 }
 0x118   : > { %v287_v12 = vpop.f32.mrb[0].mxu0 }
 0x119   : > { %v288_v13 = vadd.f32 %v287_v12, %v215_v11  ;;  %v420_v14 = vpop.f32.mrb[1].mxu0 }
 0x11b   : > { %292 = vst.msk [vmem:[%s205_s23] sm:$0xf] %vm291_vm2, %v288_v13 }
 0x11c   : > { %539 = shalt.err (!%p536_p5)
}
 0x11d   : > { %s540_s11 = scalar_lea.hbm %s769_s4, 64  ;;  %s544_s8 = scalar_lea.hbm %s821_s3, 128 }
 0x11e   : > { %p541_p4 = scmp.ne.s32.totalorder %s769_s4, %s540_s11  ;;  %p545_p12 = scmp.lt.u32.totalorder %s769_s4, %s821_s3 }
 0x11f   : > { %p546_p1 = scmp.lt.u32.totalorder %s544_s8, %s540_s11  ;;  %p548_p8 = scmp.lt.u32.totalorder %s540_s11, %s769_s4 }
 0x120   : > { %p542_p7 = pnand %p541_p4, %p829_p9 }
 0x121   : > { %p547_p3 = por %p546_p1, %p545_p12 }
 0x122   : > { %p543_p10 = pneg %p542_p7 }
 0x123   : > { %p549_p11 = por %p548_p8, %p547_p3 }
 0x125   : > { %p550_p0 = pnand %p549_p11, %p543_p10 }
 0x127   : > { %553 = shalt.err (!%p550_p0)
}
 0x128   : > { %429 = dma.vmem_to_hbm [thread:$0]  (%p829_p9), %s771_s28, 64, %s769_s4, %s294_s5  }
 0x129 PF: > { %s320_s10 = sand.u32 1, %s588_s12   ;;  %p830_p6 = scmp.ne.s32.totalorder %s826_s27, 0 }
 0x12a   : > { %p831_p13 = scmp.ge.s32.totalorder %s608_s17, 2  ;;  %s321_s22 = scalar_lea.sflag [#allocation4], %s320_s10 }
 0x12c   : > { %p436_p2 = pnand %p831_p13, %p830_p6 }
 0x12e   : > { %583 = dma.done.wait (!%p436_p2), %s321_s22, 64  }
 0x12f   : > { %585 = vsyncadd (!%p436_p2), %s321_s22, 4294967232  ;;  %s19_s17 = sadd.s32 1, %s608_s17   ;;  %s832_s12 = smov %s592_s13 }
 0x130   : > { %p16_p5 = scmp.ge.s32.totalorder %s19_s17, 4   ;;  %s833_s13 = smov %s596_s14 }
 0x131   : > { %s834_s14 = smov %s694_s26  ;;  %s835_s15 = smov %s604_s16 }
 0x132   : > { %s836_s16 = smov %s838_s20  ;;  %18 = sbr.rel (!%p16_p5) target bundleno = 6 (0x6), region = 77 }
 0x139   :  { %326 = vsyncpa [#allocation3], 1 }
 0x13a   :  { %328 = vsyncpa [#allocation3 + $0x1], 1 }
 0x13b   :  { %329 = vsyncpa [#allocation4], 1 }
 0x13c   :  { %331 = vsyncpa [#allocation4 + $0x1], 1 }

</bundles_post_ra>
